<compile_context>
chip_gen: v7x
topology: tpu7x:2x2x1
jax: 0.10.0
libtpu: 0.0.40
codegen_flags: <defaults>
</compile_context>

<pallas_src>
import functools

import jax
import jax.numpy as jnp
from jax.experimental import pallas as pl
from jax.experimental.pallas import tpu as pltpu


def _round_up(n, m):
    return ((n + m - 1) // m) * m


def _choose_batch_tile(B, batch_tile):
    """Batch tile: multiple of 16 (bf16 sublane packing), as large as batch_tile
    allows, but guaranteeing >= 2 grid steps when the batch permits so the
    "parallel" axis shards across both TensorCores on v7x."""
    B16 = _round_up(B, 16)
    tb = _round_up(min(batch_tile, B16), 16)
    if (B16 + tb - 1) // tb < 2 and B16 >= 32:
        tb = _round_up((B16 + 1) // 2, 16)
    return tb


def _snn_kernel(x_ref, w1_ref, b1_ref, w2_ref, b2_ref, w3_ref, b3_ref, spk_ref,
                *, beta, threshold):
    def lif_from_rest(cur, out_dtype):
        # snnTorch Leaky (subtract reset) with previous membrane == 0:
        #   reset   = (0 > thr)                    -> trace-time constant
        #   mem_new = beta*0 + cur - reset*thr
        #   spk     = (mem_new > thr)
        # Spikes are {0,1}: exact in bf16, so we emit them in the dtype the next
        # MXU pass (or the output store) wants and skip a separate cast pass.
        reset = 1.0 if (0.0 > threshold) else 0.0
        mem_new = beta * 0.0 + cur - reset * threshold
        return (mem_new > threshold).astype(out_dtype)

    x = x_ref[...]                                            # (TB, I) bf16
    h1 = jnp.dot(x, w1_ref[...], preferred_element_type=jnp.float32) + b1_ref[...]
    s1 = lif_from_rest(h1, jnp.bfloat16)

    h2 = jnp.dot(s1, w2_ref[...], preferred_element_type=jnp.float32) + b2_ref[...]
    s2 = lif_from_rest(h2, jnp.bfloat16)

    h3 = jnp.dot(s2, w3_ref[...], preferred_element_type=jnp.float32) + b3_ref[...]
    spk_ref[...] = lif_from_rest(h3, spk_ref.dtype)


def prepare_params(params, *, lane=128):
    """Pad hidden/output feature dims to 128-lane multiples and cast weights to
    bf16 (f32 accumulation keeps the dot exact up to bf16 operand rounding).
    The input dim I is NOT padded -- w1 stays (I, Hp) and the x block carries the
    full I extent, which satisfies the (8,128) BlockSpec rule.  Zero-padded K rows
    contribute 0 to the dots; padded N columns are sliced off by the wrapper."""
    w1, b1, w2, b2, w3, b3 = params
    I, H = w1.shape
    O = w3.shape[1]
    Hp, Op = _round_up(H, lane), _round_up(O, lane)

    def pad2(a, rows, cols):
        return jnp.pad(a, ((0, rows - a.shape[0]), (0, cols - a.shape[1])))

    w1p = pad2(w1, I, Hp).astype(jnp.bfloat16)
    b1p = pad2(b1, 1, Hp)                       # biases add into f32 accumulators
    w2p = pad2(w2, Hp, Hp).astype(jnp.bfloat16)
    b2p = pad2(b2, 1, Hp)
    w3p = pad2(w3, Hp, Op).astype(jnp.bfloat16)
    b3p = pad2(b3, 1, Op)
    return (w1p, b1p, w2p, b2p, w3p, b3p), (Hp, Op)


def snn_forward(x, params, *, beta=0.9, threshold=1.0, batch_tile=1024):
    """Fused forward: 3 matmuls + 3 LIF threshold updates, batch-tiled grid."""
    B, I = x.shape
    O = params[5].shape[1]
    (w1, b1, w2, b2, w3, b3), (Hp, Op) = prepare_params(params)
    assert w1.shape[0] == I

    TB = _choose_batch_tile(B, batch_tile)
    Bp = _round_up(B, TB)

    x_bf = x.astype(jnp.bfloat16)
    if Bp != B:
        # Padded batch rows are all-zero; they may still "spike" wherever bias >
        # threshold, but those rows are sliced off below -- never read them.
        x_bf = jnp.pad(x_bf, ((0, Bp - B), (0, 0)))

    kernel = functools.partial(_snn_kernel, beta=beta, threshold=threshold)

    def resident(a):
        # Constant index_map -> fetched once, stays resident in VMEM across steps.
        return pl.BlockSpec(a.shape, lambda i: (0, 0))

    flops = 2 * Bp * (I * Hp + Hp * Hp + Hp * Op)
    bytes_accessed = (x_bf.size * 2
                      + w1.size * 2 + b1.size * 4
                      + w2.size * 2 + b2.size * 4
                      + w3.size * 2 + b3.size * 4
                      + Bp * Op * 2)

    out = pl.pallas_call(
        kernel,
        out_shape=jax.ShapeDtypeStruct((Bp, Op), jnp.bfloat16),
        grid=(Bp // TB,),
        in_specs=[
            pl.BlockSpec((TB, I), lambda i: (i, 0)),    # activations: batch-tiled
            resident(w1), resident(b1),
            resident(w2), resident(b2),
            resident(w3), resident(b3),
        ],
        out_specs=pl.BlockSpec((TB, Op), lambda i: (i, 0)),  # lane-dense (Op = 128k)
        compiler_params=pltpu.CompilerParams(
            dimension_semantics=("parallel",),          # shards across TCs on v7x
            vmem_limit_bytes=32 * 1024 * 1024,
        ),
        cost_estimate=pl.CostEstimate(
            flops=flops, transcendentals=0, bytes_accessed=bytes_accessed),
    )(x_bf, w1, b1, w2, b2, w3, b3)

    # Spikes are {0,1}: bf16 -> f32 cast is exact; slice off batch/lane padding.
    return out[:B, :O].astype(jnp.float32)


def init_params(key, input_size, hidden_size, output_size):
    """PyTorch-style Linear init: U(-1/sqrt(fan_in), +1/sqrt(fan_in)).
    Weights stored as [in, out] (transposed vs. PyTorch's [out, in])."""
    ks = jax.random.split(key, 6)

    def linear(kw, kb, fan_in, fan_out):
        bound = 1.0 / jnp.sqrt(jnp.float32(fan_in))
        w = jax.random.uniform(kw, (fan_in, fan_out), jnp.float32, -bound, bound)
        b = jax.random.uniform(kb, (1, fan_out), jnp.float32, -bound, bound)
        return w, b

    w1, b1 = linear(ks[0], ks[1], input_size, hidden_size)
    w2, b2 = linear(ks[2], ks[3], hidden_size, hidden_size)
    w3, b3 = linear(ks[4], ks[5], hidden_size, output_size)
    return (w1, b1, w2, b2, w3, b3)


def snn_reference(x, params, *, beta=0.9, threshold=1.0):
    """Pure-JAX reference of the same forward pass, using the SAME bf16-operand /
    f32-accumulate numerics as the kernel (spike values are exact in bf16; bf16
    weights/inputs differ from pure-f32 snnTorch by ~1e-3 pre-threshold, which can
    flip knife-edge spike decisions -- accepted tolerance)."""
    w1, b1, w2, b2, w3, b3 = params
    B = x.shape[0]

    def lif(cur, mem_prev):
        reset = (mem_prev > threshold).astype(jnp.float32)
        mem = beta * mem_prev + cur - reset * threshold
        return (mem > threshold).astype(jnp.float32), mem

    m1 = jnp.zeros((B, w1.shape[1]), jnp.float32)
    m2 = jnp.zeros((B, w2.shape[1]), jnp.float32)
    m3 = jnp.zeros((B, w3.shape[1]), jnp.float32)

    s1, _ = lif(jnp.dot(x.astype(jnp.bfloat16), w1.astype(jnp.bfloat16),
                        preferred_element_type=jnp.float32) + b1, m1)
    s2, _ = lif(jnp.dot(s1.astype(jnp.bfloat16), w2.astype(jnp.bfloat16),
                        preferred_element_type=jnp.float32) + b2, m2)
    s3, _ = lif(jnp.dot(s2.astype(jnp.bfloat16), w3.astype(jnp.bfloat16),
                        preferred_element_type=jnp.float32) + b3, m3)
    return s3


if __name__ == "__main__":
    input_size, hidden_size, output_size = 16, 32, 10
    batch = 8
    beta = 0.9

    key = jax.random.PRNGKey(0)
    k_param, k_x = jax.random.split(key)
    params = init_params(k_param, input_size, hidden_size, output_size)
    # Scale inputs so some neurons actually cross the threshold.
    x = 4.0 * jax.random.normal(k_x, (batch, input_size), jnp.float32)

    out = jax.block_until_ready(snn_forward(x, params, beta=beta))
    ref = snn_reference(x, params, beta=beta)

    assert out.shape == (batch, output_size)
    assert jnp.allclose(out, ref, atol=1e-5), "Pallas output mismatch vs reference"

    # TODO(synk): spike_grad (surrogate gradient) only affects the backward pass; not
    # implemented since only the forward is requested.
    print("KERNEL_OK")
</pallas_src>

<mosaic_0001>
module attributes {stable_mosaic.version = 11 : i64} {
  func.func @_snn_kernel(%arg0: i32, %arg1: memref<16x16xbf16, #tpu.memory_space<vmem>>, %arg2: memref<16x128xbf16, #tpu.memory_space<vmem>>, %arg3: memref<1x128xf32, #tpu.memory_space<vmem>>, %arg4: memref<128x128xbf16, #tpu.memory_space<vmem>>, %arg5: memref<1x128xf32, #tpu.memory_space<vmem>>, %arg6: memref<128x128xbf16, #tpu.memory_space<vmem>>, %arg7: memref<1x128xf32, #tpu.memory_space<vmem>>, %arg8: memref<16x128xbf16, #tpu.memory_space<vmem>>) attributes {dimension_semantics = [#tpu.dimension_semantics<parallel>], iteration_bounds = array<i64: 1>, scalar_prefetch = 0 : i64, scratch_operands = 0 : i64, tpu.core_type = #tpu.core_type<tc>, window_params = [{transform_indices = @transform_0, window_bounds = array<i64: 16, 16>}, {pipeline_mode = #tpu.pipeline_mode<synchronous>, transform_indices = @transform_1, window_bounds = array<i64: 16, 128>}, {pipeline_mode = #tpu.pipeline_mode<synchronous>, transform_indices = @transform_2, window_bounds = array<i64: 1, 128>}, {pipeline_mode = #tpu.pipeline_mode<synchronous>, transform_indices = @transform_3, window_bounds = array<i64: 128, 128>}, {pipeline_mode = #tpu.pipeline_mode<synchronous>, transform_indices = @transform_4, window_bounds = array<i64: 1, 128>}, {pipeline_mode = #tpu.pipeline_mode<synchronous>, transform_indices = @transform_5, window_bounds = array<i64: 128, 128>}, {pipeline_mode = #tpu.pipeline_mode<synchronous>, transform_indices = @transform_6, window_bounds = array<i64: 1, 128>}, {transform_indices = @transform_7, window_bounds = array<i64: 16, 128>}]} {
    %c0 = arith.constant 0 : index
    %c0_0 = arith.constant 0 : index
    %0 = vector.load %arg1[%c0, %c0_0] : memref<16x16xbf16, #tpu.memory_space<vmem>>, vector<16x16xbf16>
    %c0_1 = arith.constant 0 : index
    %c0_2 = arith.constant 0 : index
    %1 = vector.load %arg2[%c0_1, %c0_2] : memref<16x128xbf16, #tpu.memory_space<vmem>>, vector<16x128xbf16>
    %cst = arith.constant dense<0.000000e+00> : vector<16x128xf32>
    %2 = tpu.matmul %0, %1, %cst {dimension_numbers = #tpu.dot_dimension_numbers<[1], [0], [0], [1], [0, 0, 1, 1], [], []>} : vector<16x16xbf16>, vector<16x128xbf16>, vector<16x128xf32> -> vector<16x128xf32>
    %c0_3 = arith.constant 0 : index
    %c0_4 = arith.constant 0 : index
    %3 = vector.load %arg3[%c0_3, %c0_4] : memref<1x128xf32, #tpu.memory_space<vmem>>, vector<1x128xf32>
    %4 = vector.broadcast %3 : vector<1x128xf32> to vector<16x128xf32>
    %5 = arith.addf %2, %4 : vector<16x128xf32>
    %cst_5 = arith.constant 0.000000e+00 : f32
    %6 = vector.broadcast %cst_5 : f32 to vector<16x128xf32>
    %7 = arith.addf %6, %5 : vector<16x128xf32>
    %cst_6 = arith.constant 0.000000e+00 : f32
    %8 = vector.broadcast %cst_6 : f32 to vector<16x128xf32>
    %9 = arith.subf %7, %8 : vector<16x128xf32>
    %cst_7 = arith.constant 1.000000e+00 : f32
    %10 = vector.broadcast %cst_7 : f32 to vector<16x128xf32>
    %11 = arith.cmpf ogt, %9, %10 : vector<16x128xf32>
    %12 = arith.extui %11 : vector<16x128xi1> to vector<16x128xi32>
    %13 = arith.sitofp %12 : vector<16x128xi32> to vector<16x128xf32>
    %14 = arith.truncf %13 : vector<16x128xf32> to vector<16x128xbf16>
    %c0_8 = arith.constant 0 : index
    %c0_9 = arith.constant 0 : index
    %15 = vector.load %arg4[%c0_8, %c0_9] : memref<128x128xbf16, #tpu.memory_space<vmem>>, vector<128x128xbf16>
    %cst_10 = arith.constant dense<0.000000e+00> : vector<16x128xf32>
    %16 = tpu.matmul %14, %15, %cst_10 {dimension_numbers = #tpu.dot_dimension_numbers<[1], [0], [0], [1], [0, 0, 1, 1], [], []>} : vector<16x128xbf16>, vector<128x128xbf16>, vector<16x128xf32> -> vector<16x128xf32>
    %c0_11 = arith.constant 0 : index
    %c0_12 = arith.constant 0 : index
    %17 = vector.load %arg5[%c0_11, %c0_12] : memref<1x128xf32, #tpu.memory_space<vmem>>, vector<1x128xf32>
    %18 = vector.broadcast %17 : vector<1x128xf32> to vector<16x128xf32>
    %19 = arith.addf %16, %18 : vector<16x128xf32>
    %cst_13 = arith.constant 0.000000e+00 : f32
    %20 = vector.broadcast %cst_13 : f32 to vector<16x128xf32>
    %21 = arith.addf %20, %19 : vector<16x128xf32>
    %cst_14 = arith.constant 0.000000e+00 : f32
    %22 = vector.broadcast %cst_14 : f32 to vector<16x128xf32>
    %23 = arith.subf %21, %22 : vector<16x128xf32>
    %cst_15 = arith.constant 1.000000e+00 : f32
    %24 = vector.broadcast %cst_15 : f32 to vector<16x128xf32>
    %25 = arith.cmpf ogt, %23, %24 : vector<16x128xf32>
    %26 = arith.extui %25 : vector<16x128xi1> to vector<16x128xi32>
    %27 = arith.sitofp %26 : vector<16x128xi32> to vector<16x128xf32>
    %28 = arith.truncf %27 : vector<16x128xf32> to vector<16x128xbf16>
    %c0_16 = arith.constant 0 : index
    %c0_17 = arith.constant 0 : index
    %29 = vector.load %arg6[%c0_16, %c0_17] : memref<128x128xbf16, #tpu.memory_space<vmem>>, vector<128x128xbf16>
    %cst_18 = arith.constant dense<0.000000e+00> : vector<16x128xf32>
    %30 = tpu.matmul %28, %29, %cst_18 {dimension_numbers = #tpu.dot_dimension_numbers<[1], [0], [0], [1], [0, 0, 1, 1], [], []>} : vector<16x128xbf16>, vector<128x128xbf16>, vector<16x128xf32> -> vector<16x128xf32>
    %c0_19 = arith.constant 0 : index
    %c0_20 = arith.constant 0 : index
    %31 = vector.load %arg7[%c0_19, %c0_20] : memref<1x128xf32, #tpu.memory_space<vmem>>, vector<1x128xf32>
    %32 = vector.broadcast %31 : vector<1x128xf32> to vector<16x128xf32>
    %33 = arith.addf %30, %32 : vector<16x128xf32>
    %cst_21 = arith.constant 0.000000e+00 : f32
    %34 = vector.broadcast %cst_21 : f32 to vector<16x128xf32>
    %35 = arith.addf %34, %33 : vector<16x128xf32>
    %cst_22 = arith.constant 0.000000e+00 : f32
    %36 = vector.broadcast %cst_22 : f32 to vector<16x128xf32>
    %37 = arith.subf %35, %36 : vector<16x128xf32>
    %cst_23 = arith.constant 1.000000e+00 : f32
    %38 = vector.broadcast %cst_23 : f32 to vector<16x128xf32>
    %39 = arith.cmpf ogt, %37, %38 : vector<16x128xf32>
    %40 = arith.extui %39 : vector<16x128xi1> to vector<16x128xi32>
    %41 = arith.sitofp %40 : vector<16x128xi32> to vector<16x128xf32>
    %42 = arith.truncf %41 : vector<16x128xf32> to vector<16x128xbf16>
    %c0_24 = arith.constant 0 : index
    %c0_25 = arith.constant 0 : index
    %43 = vector.load %arg8[%c0_24, %c0_25] : memref<16x128xbf16, #tpu.memory_space<vmem>>, vector<16x128xbf16>
    tpu.vector_store %arg8[%c0_24, %c0_25], %42 {strides = array<i32>} : memref<16x128xbf16, #tpu.memory_space<vmem>>, vector<16x128xbf16>,
    return
  }
  func.func @transform_0(%arg0: i32) -> (i32, i32) {
    %c0_i32 = arith.constant 0 : i32
    %c0_i32_0 = arith.constant 0 : i32
    return %arg0, %c0_i32 : i32, i32
  }
  func.func @transform_1(%arg0: i32) -> (i32, i32) {
    %c0_i32 = arith.constant 0 : i32
    %c0_i32_0 = arith.constant 0 : i32
    %c0_i32_1 = arith.constant 0 : i32
    return %c0_i32, %c0_i32_0 : i32, i32
  }
  func.func @transform_2(%arg0: i32) -> (i32, i32) {
    %c0_i32 = arith.constant 0 : i32
    %c0_i32_0 = arith.constant 0 : i32
    %c0_i32_1 = arith.constant 0 : i32
    return %c0_i32, %c0_i32_0 : i32, i32
  }
  func.func @transform_3(%arg0: i32) -> (i32, i32) {
    %c0_i32 = arith.constant 0 : i32
    %c0_i32_0 = arith.constant 0 : i32
    %c0_i32_1 = arith.constant 0 : i32
    return %c0_i32, %c0_i32_0 : i32, i32
  }
  func.func @transform_4(%arg0: i32) -> (i32, i32) {
    %c0_i32 = arith.constant 0 : i32
    %c0_i32_0 = arith.constant 0 : i32
    %c0_i32_1 = arith.constant 0 : i32
    return %c0_i32, %c0_i32_0 : i32, i32
  }
  func.func @transform_5(%arg0: i32) -> (i32, i32) {
    %c0_i32 = arith.constant 0 : i32
    %c0_i32_0 = arith.constant 0 : i32
    %c0_i32_1 = arith.constant 0 : i32
    return %c0_i32, %c0_i32_0 : i32, i32
  }
  func.func @transform_6(%arg0: i32) -> (i32, i32) {
    %c0_i32 = arith.constant 0 : i32
    %c0_i32_0 = arith.constant 0 : i32
    %c0_i32_1 = arith.constant 0 : i32
    return %c0_i32, %c0_i32_0 : i32, i32
  }
  func.func @transform_7(%arg0: i32) -> (i32, i32) {
    %c0_i32 = arith.constant 0 : i32
    %c0_i32_0 = arith.constant 0 : i32
    return %arg0, %c0_i32 : i32, i32
  }
}

</mosaic_0001>

<bundles_post_ra>
// kernel: tpu_custom_call.1
= control target key start
LH: loop header
LB: loop body
LE: loop exit
PB: predicated region body
PF: predicated region fallthrough
CT: control target
= control target key end

     0   :  { %12 = vsyncpa [#allocation3], 0  ;;  %s850_s0 = inlined_call_operand.hbm [shape: bf16[16,16], index: 0, kind: input, shape index: {}]   ;;  %s851_s1 = inlined_call_operand.hbm [shape: bf16[16,128], index: 1, kind: input, shape index: {}]   ;;  %s852_s2 = inlined_call_operand.vmem [shape: f32[1,128], index: 2, kind: input, shape index: {}]   ;;  %s853_s3 = inlined_call_operand.hbm [shape: bf16[128,128], index: 3, kind: input, shape index: {}]   ;;  %s854_s4 = inlined_call_operand.vmem [shape: f32[1,128], index: 4, kind: input, shape index: {}]   ;;  %s855_s5 = inlined_call_operand.hbm [shape: bf16[128,128], index: 5, kind: input, shape index: {}]   ;;  %s856_s6 = inlined_call_operand.vmem [shape: f32[1,128], index: 6, kind: input, shape index: {}]   ;;  %s857_s7 = inlined_call_operand.hbm [shape: bf16[16,128], index: 7, kind: output, shape index: {}]  }
   0x1   :  { %13 = vsyncpa [#allocation6], 0 }
   0x2   :  { %14 = vsyncpa [#allocation9], 0 }
   0x3   :  { %15 = vsyncpa [#allocation4], 0  ;;  %s680_s24 = smov [#allocation5]   ;;  %s681_s26 = smov [#allocation2]  }
   0x4   :  { %s33_s25 = sshll.u32 %s680_s24, 4  ;;  %s21_s27 = sshll.u32 %s681_s26, 4  ;;  %s34_s25 = int_to_ptr.vmem [resolvable:$true] %s33_s25  ;;  %s730_s27 = int_to_ptr.vmem [resolvable:$true] %s21_s27 }
   0x5   :  { %s562_s30 = scalar_lea.hbm %s851_s1, 128 }
   0x6   :  { %p563_p0 = scmp.ne.s32.totalorder %s851_s1, %s562_s30  ;;  %p566_p1 = scmp.lt.u32.totalorder %s562_s30, %s851_s1 }
   0x8   :  { %p568_p2 = pnand %p566_p1, %p563_p0 }
   0xa   :  { %571 = shalt.err (!%p568_p2)
}
   0xb   :  { %s572_s12 = scalar_lea.vmem %s34_s25, 128  ;;  %p577_p4 = scmp.lt.s32.totalorder %s34_s25, %s34_s25 }
   0xc   :  { %p573_p3 = scmp.ne.s32.totalorder %s34_s25, %s572_s12  ;;  %p578_p5 = scmp.lt.s32.totalorder %s572_s12, %s572_s12 }
   0xe   :  { %p579_p6 = por %p578_p5, %p577_p4 }
  0x10   :  { %p580_p7 = pnand %p579_p6, %p573_p3 }
  0x12   :  { %583 = shalt.err (!%p580_p7)
}
  0x13   :  { %s682_s13 = smov 64   ;;  %s683_s14 = smov 4  }
  0x14   :  { %39 = dma.hbm_to_vmem [thread:$0]  %s851_s1, 128, %s34_s25, [#allocation6], %s682_s13, %s682_s13, %s683_s14  }
  0x15   :  { %s584_s19 = scalar_lea.hbm %s850_s0, 128 }
  0x16   :  { %p585_p8 = scmp.ne.s32.totalorder %s850_s0, %s584_s19  ;;  %p588_p9 = scmp.lt.u32.totalorder %s584_s19, %s850_s0 }
  0x18   :  { %p590_p10 = pnand %p588_p9, %p585_p8 }
  0x1a   :  { %593 = shalt.err (!%p590_p10)
}
  0x1b   :  { %s594_s24 = scalar_lea.vmem %s730_s27, 128  ;;  %p599_p12 = scmp.lt.s32.totalorder %s730_s27, %s730_s27 }
  0x1c   :  { %p595_p11 = scmp.ne.s32.totalorder %s730_s27, %s594_s24  ;;  %p600_p13 = scmp.lt.s32.totalorder %s594_s24, %s594_s24 }
  0x1e   :  { %p601_p0 = por %p600_p13, %p599_p12 }
  0x20   :  { %p602_p1 = pnand %p601_p0, %p595_p11 }
  0x22   :  { %605 = shalt.err (!%p602_p1)
}
  0x23   :  { %27 = dma.hbm_to_vmem [thread:$0]  %s850_s0, 128, %s730_s27, [#allocation3], %s682_s13, %s682_s13, %s683_s14  }
  0x24   :  { %s684_s26 = smov [#allocation7]   ;;  %s685_s29 = smov [#allocation8]  }
  0x25   :  { %s47_s28 = sshll.u32 %s684_s26, 4  ;;  %s61_s30 = sshll.u32 %s685_s29, 4  ;;  %s48_s28 = int_to_ptr.vmem [resolvable:$true] %s47_s28  ;;  %s767_s30 = int_to_ptr.vmem [resolvable:$true] %s61_s30 }
  0x26   :  { %s606_s10 = scalar_lea.hbm %s853_s3, 1024 }
  0x27   :  { %p607_p2 = scmp.ne.s32.totalorder %s853_s3, %s606_s10  ;;  %p610_p3 = scmp.lt.u32.totalorder %s606_s10, %s853_s3 }
  0x29   :  { %p612_p4 = pnand %p610_p3, %p607_p2 }
  0x2b   :  { %615 = shalt.err (!%p612_p4)
}
  0x2c   :  { %s616_s0 = scalar_lea.vmem %s48_s28, 1024  ;;  %p621_p6 = scmp.lt.s32.totalorder %s48_s28, %s48_s28 }
  0x2d   :  { %p617_p5 = scmp.ne.s32.totalorder %s48_s28, %s616_s0  ;;  %p622_p7 = scmp.lt.s32.totalorder %s616_s0, %s616_s0 }
  0x2f   :  { %p623_p8 = por %p622_p7, %p621_p6 }
  0x31   :  { %p624_p9 = pnand %p623_p8, %p617_p5 }
  0x33   :  { %627 = shalt.err (!%p624_p9)
}
  0x34   :  { %53 = dma.hbm_to_vmem [thread:$0]  %s853_s3, 1024, %s48_s28, [#allocation6], %s682_s13, %s682_s13, %s683_s14  }
  0x35   :  { %s628_s20 = scalar_lea.hbm %s855_s5, 1024 }
  0x36   :  { %p629_p10 = scmp.ne.s32.totalorder %s855_s5, %s628_s20  ;;  %p632_p11 = scmp.lt.u32.totalorder %s628_s20, %s855_s5 }
  0x38   :  { %p634_p12 = pnand %p632_p11, %p629_p10 }
  0x3a   :  { %637 = shalt.err (!%p634_p12)
}
  0x3b   :  { %s638_s1 = scalar_lea.vmem %s767_s30, 1024  ;;  %p643_p0 = scmp.lt.s32.totalorder %s767_s30, %s767_s30 }
  0x3c   :  { %p639_p13 = scmp.ne.s32.totalorder %s767_s30, %s638_s1  ;;  %p644_p1 = scmp.lt.s32.totalorder %s638_s1, %s638_s1 }
  0x3e   :  { %p645_p2 = por %p644_p1, %p643_p0 }
  0x40   :  { %p646_p3 = pnand %p645_p2, %p639_p13 }
  0x42   :  { %649 = shalt.err (!%p646_p3)
}
  0x43   :  { %67 = dma.hbm_to_vmem [thread:$0]  %s855_s5, 1024, %s767_s30, [#allocation9], %s682_s13, %s682_s13, %s683_s14  }
  0x44   :  { %672 = dma.done.wait [#allocation3], 128  }
  0x45   :  { %673 = vsyncadd [#allocation3], 4294967168 }
  0x46   :  { %674 = dma.done.wait [#allocation6], 1152  }
  0x47   :  { %675 = vsyncadd [#allocation6], 4294966144 }
  0x48   :  { %676 = dma.done.wait [#allocation9], 1024  }
  0x49   :  { %677 = vsyncadd [#allocation9], 4294966272  ;;  %v686_v0 = vmov 0.0   ;;  %vm687_vm0 = vmmov 0   ;;  %v544_v1 = vld [vmem:[#allocation5] sm:$0xff]   ;;  %v545_v2 = vld [vmem:[#allocation2] sm:$0xff]  }
  0x4a   :  { %488 = vmatprep.subr.bf16.mxu0 %v686_v0  ;;  %490 = vmatprep.mubr.msk.bf16.mxu0 %vm687_vm0, %v686_v0  ;;  %vm105_vm1 = vcmask 130048   ;;  %v546_v3 = vld [vmem:[#allocation7] sm:$0xff]   ;;  %v547_v4 = vld [vmem:[#allocation7 + $0x8] sm:$0xff]   ;;  %v548_v5 = vld [vmem:[#allocation7 + $0x10] sm:$0xff]   ;;  %v688_v24 = vmov 1.0|1.0  }
  0x4b   :  { %494 = vmatprep.subr.bf16.mxu1 %v686_v0  ;;  %510 = vmatprep.mubr.msk.bf16.mxu1 %vm687_vm0, %v686_v0  ;;  %v549_v6 = vld [vmem:[#allocation7 + $0x18] sm:$0xff]   ;;  %v550_v7 = vld [vmem:[#allocation7 + $0x20] sm:$0xff]   ;;  %v551_v8 = vld [vmem:[#allocation7 + $0x28] sm:$0xff]  }
  0x4c   :  { %489 = vmatpush3.bf16.msra.mxu0 %v544_v1  ;;  %495 = vmatpush3.bf16.msra.mxu1 %v546_v3  ;;  %v552_v9 = vld [vmem:[#allocation7 + $0x30] sm:$0xff]   ;;  %v553_v10 = vld [vmem:[#allocation7 + $0x38] sm:$0xff]   ;;  %v554_v11 = vld [vmem:[#allocation8] sm:$0xff]  }
  0x4d   :  { %514 = vmatprep.subr.bf16.mxu0 %v686_v0  ;;  %496 = vmatprep.subr.bf16.mxu1 %v686_v0  ;;  %v555_v12 = vld [vmem:[#allocation8 + $0x8] sm:$0xff]   ;;  %v556_v13 = vld [vmem:[#allocation8 + $0x10] sm:$0xff]   ;;  %v557_v14 = vld [vmem:[#allocation8 + $0x18] sm:$0xff]  }
  0x4e   :  { %v558_v15 = vld [vmem:[#allocation8 + $0x20] sm:$0xff]   ;;  %v559_v16 = vld [vmem:[#allocation8 + $0x28] sm:$0xff]   ;;  %v429_v17 = vld [vmem:[%s852_s2] ss:$0 sm:$0xff] }
  0x4f   :  { %491 = vmatmul.mubr.msk.bf16.vlgmr.msra.gmra.mrb[0].mxu0 %vm105_vm1, %v545_v2  ;;  %v560_v25 = vld [vmem:[#allocation8 + $0x30] sm:$0xff]   ;;  %v561_v26 = vld [vmem:[#allocation8 + $0x38] sm:$0xff]  }
  0x50   :  { %530 = vmatprep.mubr.msk.bf16.mxu0 %vm687_vm0, %v686_v0  ;;  %497 = vmatpush3.bf16.msra.mxu1 %v547_v4  ;;  %v435_v27 = vld [vmem:[%s854_s4] ss:$0 sm:$0xff]  ;;  %s689_s4 = smov [#allocation10]  }
  0x51   :  { %498 = vmatprep.subr.bf16.mxu1 %v686_v0  ;;  %515 = vmatpush3.bf16.msra.mxu0 %v554_v11  ;;  %v448_v34 = vld [vmem:[%s856_s6] ss:$0 sm:$0xff]  ;;  %s415_s8 = sshll.u32 %s689_s4, 4  ;;  %s416_s8 = int_to_ptr.vmem [resolvable:$true] %s415_s8 }
  0x52   :  { %516 = vmatprep.subr.bf16.mxu0 %v686_v0  ;;  %s650_s9 = scalar_lea.vmem %s416_s8, 128  ;;  %p655_p5 = scmp.lt.s32.totalorder %s416_s8, %s416_s8 }
  0x53   :  { %p651_p4 = scmp.ne.s32.totalorder %s416_s8, %s650_s9  ;;  %p656_p6 = scmp.lt.s32.totalorder %s650_s9, %s650_s9 }
  0x54   :  { %499 = vmatpush3.bf16.msra.mxu1 %v548_v5 }
  0x55   :  { %500 = vmatprep.subr.bf16.mxu1 %v686_v0  ;;  %517 = vmatpush3.bf16.msra.mxu0 %v555_v12  ;;  %p657_p7 = por %p656_p6, %p655_p5 }
  0x56   :  { %518 = vmatprep.subr.bf16.mxu0 %v686_v0 }
  0x57   :  { %p658_p8 = pnand %p657_p7, %p651_p4 }
  0x58   :  { %501 = vmatpush3.bf16.msra.mxu1 %v549_v6 }
  0x59   :  { %502 = vmatprep.subr.bf16.mxu1 %v686_v0  ;;  %519 = vmatpush3.bf16.msra.mxu0 %v556_v13 }
  0x5a   :  { %520 = vmatprep.subr.bf16.mxu0 %v686_v0 }
  0x5c   :  { %503 = vmatpush3.bf16.msra.mxu1 %v550_v7 }
  0x5d   :  { %504 = vmatprep.subr.bf16.mxu1 %v686_v0  ;;  %521 = vmatpush3.bf16.msra.mxu0 %v557_v14 }
  0x5e   :  { %522 = vmatprep.subr.bf16.mxu0 %v686_v0 }
  0x60   :  { %505 = vmatpush3.bf16.msra.mxu1 %v551_v8 }
  0x61   :  { %506 = vmatprep.subr.bf16.mxu1 %v686_v0  ;;  %523 = vmatpush3.bf16.msra.mxu0 %v558_v15 }
  0x62   :  { %524 = vmatprep.subr.bf16.mxu0 %v686_v0 }
  0x64   :  { %507 = vmatpush3.bf16.msra.mxu1 %v552_v9 }
  0x65   :  { %508 = vmatprep.subr.bf16.mxu1 %v686_v0  ;;  %525 = vmatpush3.bf16.msra.mxu0 %v559_v16 }
  0x66   :  { %526 = vmatprep.subr.bf16.mxu0 %v686_v0 }
  0x68   :  { %509 = vmatpush3.bf16.msra.mxu1 %v553_v10 }
  0x69   :  { %527 = vmatpush3.bf16.msra.mxu0 %v560_v25 }
  0x6a   :  { %528 = vmatprep.subr.bf16.mxu0 %v686_v0 }
  0x6d   :  { %529 = vmatpush3.bf16.msra.mxu0 %v561_v26 }
 0x122   :  { %v143_v18 = vpop.f32.mrb[0].mxu0 }
 0x123   :  { %v144_v19 = vadd.f32 %v429_v17, %v143_v18  ;;  %v492_v20 = vpop.f32.mrb[1].mxu0 }
 0x124   :  { %v146_v21 = vpop.f32.mrb[2].mxu0 }
 0x125   :  { %v147_v22 = vadd.f32 %v429_v17, %v146_v21  ;;  %v493_v23 = vpop.f32.mrb[3].mxu0  ;;  %vm152_vm2 = vcmp.gt.f32.partialorder %v144_v19, 1.0 }
 0x127   :  { %vm153_vm3 = vcmp.gt.f32.partialorder %v147_v22, 1.0 }
 0x128   :  { %vm444_vm4 = vmpackc.low %vm153_vm3, %vm152_vm2 }
 0x129   :  { %511 = vmatmul.mubr.msk.bf16.vlgmr.msra.gmra.mrb[0].mxu1 %vm444_vm4, %v688_v24 }
 0x1fc   :  { %v264_v28 = vpop.f32.mrb[0].mxu1 }
 0x1fd   :  { %v265_v29 = vadd.f32 %v435_v27, %v264_v28  ;;  %v512_v30 = vpop.f32.mrb[1].mxu1 }
 0x1fe   :  { %v267_v31 = vpop.f32.mrb[2].mxu1 }
 0x1ff   :  { %v268_v32 = vadd.f32 %v435_v27, %v267_v31  ;;  %v513_v33 = vpop.f32.mrb[3].mxu1  ;;  %vm273_vm5 = vcmp.gt.f32.partialorder %v265_v29, 1.0 }
 0x201   :  { %vm274_vm6 = vcmp.gt.f32.partialorder %v268_v32, 1.0 }
 0x202   :  { %vm457_vm7 = vmpackc.low %vm274_vm6, %vm273_vm5 }
 0x203   :  { %531 = vmatmul.mubr.msk.bf16.vlgmr.msra.gmra.mrb[4].mxu0 %vm457_vm7, %v688_v24 }
 0x2d6   :  { %v385_v35 = vpop.f32.mrb[4].mxu0 }
 0x2d7   :  { %v386_v36 = vadd.f32 %v448_v34, %v385_v35  ;;  %v532_v37 = vpop.f32.mrb[5].mxu0 }
 0x2d8   :  { %v388_v38 = vpop.f32.mrb[6].mxu0 }
 0x2d9   :  { %vm394_vm8 = vcmp.gt.f32.partialorder %v386_v36, 1.0  ;;  %v389_v39 = vadd.f32 %v448_v34, %v388_v38  ;;  %v533_v40 = vpop.f32.mrb[7].mxu0 }
 0x2da   :  { %v459_v41 = vsel %vm394_vm8, 1.0, %v686_v0 }
 0x2db   :  { %vm395_vm9 = vcmp.gt.f32.partialorder %v389_v39, 1.0 }
 0x2dc   :  { %v460_v42 = vsel %vm395_vm9, 1.0, %v686_v0 }
 0x2dd   :  { %v466_v43 = vpack.c.bf16 %v460_v42, %v459_v41 }
 0x2df   :  { %467 = vst [vmem:[#allocation10] sm:$0xff] %v466_v43  }
 0x2e0   :  { %661 = shalt.err (!%p658_p8)
}
 0x2e1   :  { %s662_s11 = scalar_lea.hbm %s857_s7, 128 }
 0x2e2   :  { %p663_p9 = scmp.ne.s32.totalorder %s857_s7, %s662_s11  ;;  %p666_p10 = scmp.lt.u32.totalorder %s662_s11, %s857_s7 }
 0x2e4   :  { %p668_p11 = pnand %p666_p10, %p663_p9 }
 0x2e6   :  { %671 = shalt.err (!%p668_p11)
}
 0x2e7   :  { %421 = dma.vmem_to_hbm [thread:$0]  %s416_s8, 128, %s857_s7, [#allocation4], %s682_s13, %s682_s13, %s683_s14  }
 0x2e8   :  { %678 = dma.done.wait [#allocation4], 128  }
 0x2e9   :  { %679 = vsyncadd [#allocation4], 4294967168 }
 0x2ea   :  { %425 = vsyncpa [#allocation3], 1 }
 0x2eb   :  { %426 = vsyncpa [#allocation6], 1 }
 0x2ec   :  { %427 = vsyncpa [#allocation9], 1 }
 0x2ed   :  { %428 = vsyncpa [#allocation4], 1 }

</bundles_post_ra>
